<compile_context>
chip_gen: v7x
topology: tpu7x:2x2x1
jax: 0.10.0
libtpu: 0.0.40
codegen_flags: <defaults>
</compile_context>

<pallas_src>
import functools

import jax
import jax.numpy as jnp
from jax.experimental import pallas as pl
from jax.experimental.pallas import tpu as pltpu

LANES = 128   # common lane width of every weight / activation slab
SUB = 16      # sublane alignment for bf16 row blocks (bf16 packs 16 rows/vreg)


def _round_up(v, m):
    return ((v + m - 1) // m) * m


# -----------------------------------------------------------------------------
# Fused kernel factory: conv1 -> ReLU -> conv2 (+ folded classifier)
# -----------------------------------------------------------------------------
def _make_rgcn_kernel(np_, fp_, hidp_, nblk):
    """np_: padded node count, fp_: padded in-features, hidp_: padded hidden,
    nblk = num_relations + 1 (root transform carried as an identity-adjacency
    'relation')."""
    k1 = nblk * fp_           # contraction dim of the layer-1 feature transform
    k2 = nblk * np_           # contraction dim of the relation aggregation
    w2_off = k1               # row offset of the layer-2 weight blocks in the slab

    def kernel(acat_ref,      # (np_, k2)            bf16  [A_0 | ... | A_{R-1} | I]
               xbd_ref,       # (k2, k1)             bf16  blockdiag(x, ..., x)
               w_ref,         # (k1 + nblk*hidp_,128) bf16  packed weight slab
               b_ref,         # (2, 128)             f32   row0=bias1, row1=bias2'
               o_ref,         # (np_, 128)           f32   lanes [0, num_adrs) valid
               m_ref):        # (k2, 128)            bf16  row-stacked messages (scratch)
        acat = acat_ref[...]

        # ---- conv1: ALL per-relation feature transforms (incl. root) in one
        #      MXU matmul, then ONE K=k2 aggregation matmul.
        m_ref[...] = jnp.dot(xbd_ref[...], w_ref[0:k1, :],
                             preferred_element_type=jnp.float32
                             ).astype(jnp.bfloat16)
        h = jnp.dot(acat, m_ref[...], preferred_element_type=jnp.float32)
        h = jnp.maximum(h + b_ref[0:1, :], 0.0)           # (np_, 128); lanes >= hid are 0
        hc = h[:, :hidp_].astype(jnp.bfloat16)            # (np_, hidp_), lane offset 0

        # ---- conv2 (+ classifier folded into W2'/root2'/bias2'): independent
        #      per-relation message dots into 16-aligned scratch row blocks,
        #      then ONE K=k2 aggregation matmul.
        for r in range(nblk):                             # nblk = 5, static -> unrolled
            wblk = w_ref[w2_off + r * hidp_: w2_off + (r + 1) * hidp_, :]
            m_ref[r * np_:(r + 1) * np_, :] = jnp.dot(
                hc, wblk, preferred_element_type=jnp.float32).astype(jnp.bfloat16)
        o_ref[...] = (jnp.dot(acat, m_ref[...], preferred_element_type=jnp.float32)
                      + b_ref[1:2, :])

    return kernel


# -----------------------------------------------------------------------------
# One-time weight prep (hoisted out of the per-call path)
# -----------------------------------------------------------------------------
def pack_weights(params):
    """Basis composition, classifier fold, root-as-extra-relation stacking,
    (SUB, 128) zero-padding and bf16 cast.  Returns (w_slab bf16, biases f32)."""
    w1 = jnp.einsum("rb,bio->rio", params["comp1"], params["basis1"])   # (R, FIN, HID)
    w2 = jnp.einsum("rb,bio->rio", params["comp2"], params["basis2"])   # (R, HID, OUT)
    # Fold the classifier (linear after linear, no nonlinearity in between).
    w2f = jnp.einsum("rho,oa->rha", w2, params["cls_w"])                # (R, HID, NA)
    root2f = params["root2"] @ params["cls_w"]                          # (HID, NA)
    bias2f = params["bias2"] @ params["cls_w"] + params["cls_b"]        # (1, NA)

    num_rel = params["comp1"].shape[0]
    fin, hid = params["root1"].shape
    na = params["cls_w"].shape[1]
    fp, hidp = _round_up(fin, SUB), _round_up(hid, SUB)
    assert hid <= LANES and na <= LANES

    # layer-1 stack: (R+1) blocks of fp rows -> [W1_0; ...; W1_{R-1}; root1]
    w1_all = jnp.concatenate([w1, params["root1"][None]], axis=0)       # (R+1, FIN, HID)
    w1_pad = jnp.zeros((num_rel + 1, fp, LANES), jnp.float32)
    w1_pad = w1_pad.at[:, :fin, :hid].set(w1_all)
    # layer-2 stack: (R+1) blocks of hidp rows -> [W2'_0; ...; W2'_{R-1}; root2']
    w2_all = jnp.concatenate([w2f, root2f[None]], axis=0)               # (R+1, HID, NA)
    w2_pad = jnp.zeros((num_rel + 1, hidp, LANES), jnp.float32)
    w2_pad = w2_pad.at[:, :hid, :na].set(w2_all)

    w_slab = jnp.concatenate(
        [w1_pad.reshape((num_rel + 1) * fp, LANES),
         w2_pad.reshape((num_rel + 1) * hidp, LANES)], axis=0).astype(jnp.bfloat16)

    # Biases stay exact f32 in a tiny separate operand.
    biases = jnp.zeros((2, LANES), jnp.float32)
    biases = biases.at[0, :hid].set(params["bias1"][0])
    biases = biases.at[1, :na].set(bias2f[0])
    return w_slab, biases


# -----------------------------------------------------------------------------
# Per-graph prep: lane-concatenated adjacency (+identity block) and blockdiag(x)
# -----------------------------------------------------------------------------
def pack_graph(x, adj_norm):
    num_rel, n, _ = adj_norm.shape
    fin = x.shape[1]
    np_, fp = _round_up(n, SUB), _round_up(fin, SUB)

    a_pad = jnp.zeros((num_rel, np_, np_), jnp.float32).at[:, :n, :n].set(adj_norm)
    a_ext = jnp.concatenate([a_pad, jnp.eye(np_, dtype=jnp.float32)[None]], axis=0)
    a_cat = jnp.transpose(a_ext, (1, 0, 2)).reshape(np_, (num_rel + 1) * np_)

    x_pad = jnp.zeros((np_, fp), jnp.float32).at[:n, :fin].set(x)
    x_bd = jnp.kron(jnp.eye(num_rel + 1, dtype=jnp.float32), x_pad)
    return a_cat.astype(jnp.bfloat16), x_bd.astype(jnp.bfloat16)


# -----------------------------------------------------------------------------
# pallas_call wrapper
# -----------------------------------------------------------------------------
def rgcn_apply(a_cat, x_bd, w_slab, biases, num_nodes, num_adrs):
    np_, k2 = a_cat.shape
    k1 = x_bd.shape[1]
    nblk = k2 // np_
    fp = k1 // nblk
    hidp = (w_slab.shape[0] - k1) // nblk

    kernel = _make_rgcn_kernel(np_, fp, hidp, nblk)
    vmem = pl.BlockSpec(memory_space=pltpu.MemorySpace.VMEM)
    out = pl.pallas_call(
        kernel,
        out_shape=jax.ShapeDtypeStruct((np_, LANES), jnp.float32),
        in_specs=[vmem, vmem, vmem, vmem],
        out_specs=vmem,
        scratch_shapes=[pltpu.VMEM((k2, LANES), jnp.bfloat16)],
    )(a_cat, x_bd, w_slab, biases)
    # Lane-dense (np_, 128) store inside the kernel; narrow to real logits here.
    return out[:num_nodes, :num_adrs]


def rgcn_forward(x, adj_norm, params):
    """Convenience one-shot forward: x (N, Fin), adj_norm (R, N, N) -> (N, num_adrs)."""
    w_slab, biases = pack_weights(params)
    a_cat, x_bd = pack_graph(x, adj_norm)
    return rgcn_apply(a_cat, x_bd, w_slab, biases, x.shape[0],
                      params["cls_w"].shape[1])


# -----------------------------------------------------------------------------
# Glue: graph preprocessing + deterministic parameter init
# -----------------------------------------------------------------------------
def build_norm_adj(edge_index, edge_type, num_nodes, num_relations):
    """A[r, i, j] = (#edges j->i of type r) / (#incoming edges at i of type r).
    NOTE: duplicate (parallel) edges are counted in numerator and degree, which
    matches PyG RGCNConv aggr='mean' when duplicates are retained."""
    src, dst = edge_index[0], edge_index[1]
    a = jnp.zeros((num_relations, num_nodes, num_nodes), dtype=jnp.float32)
    a = a.at[edge_type, dst, src].add(1.0)
    deg = a.sum(axis=2, keepdims=True)
    return a / jnp.maximum(deg, 1.0)


def make_params(key, in_c, hid_c, out_c, num_relations, num_adrs, num_bases):
    ks = jax.random.split(key, 10)

    def init(k, shape, scale=0.1):
        return (scale * jax.random.normal(k, shape)).astype(jnp.float32)

    return {
        # conv1 (basis decomposition, num_bases=30)
        "basis1": init(ks[0], (num_bases, in_c, hid_c)),
        "comp1": init(ks[1], (num_relations, num_bases)),
        "root1": init(ks[2], (in_c, hid_c)),
        "bias1": init(ks[3], (1, hid_c)),
        # conv2
        "basis2": init(ks[4], (num_bases, hid_c, out_c)),
        "comp2": init(ks[5], (num_relations, num_bases)),
        "root2": init(ks[6], (hid_c, out_c)),
        "bias2": init(ks[7], (1, out_c)),
        # classifier nn.Linear(out_c, num_adrs), stored pre-transposed
        "cls_w": init(ks[8], (out_c, num_adrs)),
        "cls_b": init(ks[9], (1, num_adrs)),
    }


# -----------------------------------------------------------------------------
if __name__ == "__main__":
    # Shapes consistent with the module: x = eye(39) -> 39 nodes, 39 features.
    N = 39
    IN_C = 39
    HID_C = 32
    OUT_C = 16
    NUM_RELATIONS = 4
    NUM_ADRS = 10
    NUM_BASES = 30
    NUM_EDGES = 120

    key = jax.random.PRNGKey(0)
    k_src, k_dst, k_type, k_param = jax.random.split(key, 4)

    # Deterministic synthetic graph (stands in for gnn_data/edge_index.pt etc.)
    src = jax.random.randint(k_src, (NUM_EDGES,), 0, N)
    dst = jax.random.randint(k_dst, (NUM_EDGES,), 0, N)
    edge_index = jnp.stack([src, dst])                    # (2, E)
    edge_type = jax.random.randint(k_type, (NUM_EDGES,), 0, NUM_RELATIONS)

    x = jnp.eye(N, dtype=jnp.float32)                     # (39, 39) one-hot features
    adj_norm = build_norm_adj(edge_index, edge_type, N, NUM_RELATIONS)
    params = make_params(k_param, IN_C, HID_C, OUT_C,
                         NUM_RELATIONS, NUM_ADRS, NUM_BASES)

    # One-time prep hoisted out of the per-call path (review item: weight prep
    # is static at inference); per-graph packing is a cheap XLA op.
    w_slab, biases = pack_weights(params)
    a_cat, x_bd = pack_graph(x, adj_norm)

    fwd = jax.jit(functools.partial(rgcn_apply, num_nodes=N, num_adrs=NUM_ADRS))
    out = jax.block_until_ready(fwd(a_cat, x_bd, w_slab, biases))
    assert out.shape == (N, NUM_ADRS) and out.dtype == jnp.float32
    print("KERNEL_OK")
</pallas_src>

<mosaic_0001>
module attributes {stable_mosaic.version = 11 : i64} {
  func.func @kernel(%arg0: memref<48x240xbf16, #tpu.memory_space<vmem>>, %arg1: memref<240x240xbf16, #tpu.memory_space<vmem>>, %arg2: memref<400x128xbf16, #tpu.memory_space<vmem>>, %arg3: memref<2x128xf32, #tpu.memory_space<vmem>>, %arg4: memref<48x128xf32, #tpu.memory_space<vmem>>, %arg5: memref<240x128xbf16, #tpu.memory_space<vmem>>) attributes {dimension_semantics = [], scalar_prefetch = 0 : i64, scratch_operands = 1 : i64, tpu.core_type = #tpu.core_type<tc>} {
    %c0 = arith.constant 0 : index
    %c0_0 = arith.constant 0 : index
    %0 = vector.load %arg0[%c0, %c0_0] : memref<48x240xbf16, #tpu.memory_space<vmem>>, vector<48x240xbf16>
    %c0_1 = arith.constant 0 : index
    %c0_2 = arith.constant 0 : index
    %1 = vector.load %arg1[%c0_1, %c0_2] : memref<240x240xbf16, #tpu.memory_space<vmem>>, vector<240x240xbf16>
    %c0_3 = arith.constant 0 : index
    %c0_4 = arith.constant 0 : index
    %2 = vector.load %arg2[%c0_3, %c0_4] : memref<400x128xbf16, #tpu.memory_space<vmem>>, vector<240x128xbf16>
    %cst = arith.constant dense<0.000000e+00> : vector<240x128xf32>
    %3 = tpu.matmul %1, %2, %cst {dimension_numbers = #tpu.dot_dimension_numbers<[1], [0], [0], [1], [0, 0, 1, 1], [], []>} : vector<240x240xbf16>, vector<240x128xbf16>, vector<240x128xf32> -> vector<240x128xf32>
    %4 = arith.truncf %3 : vector<240x128xf32> to vector<240x128xbf16>
    %c0_5 = arith.constant 0 : index
    %c0_6 = arith.constant 0 : index
    %5 = vector.load %arg5[%c0_5, %c0_6] : memref<240x128xbf16, #tpu.memory_space<vmem>>, vector<240x128xbf16>
    tpu.vector_store %arg5[%c0_5, %c0_6], %4 {strides = array<i32>} : memref<240x128xbf16, #tpu.memory_space<vmem>>, vector<240x128xbf16>,
    %c0_7 = arith.constant 0 : index
    %c0_8 = arith.constant 0 : index
    %6 = vector.load %arg5[%c0_7, %c0_8] : memref<240x128xbf16, #tpu.memory_space<vmem>>, vector<240x128xbf16>
    %cst_9 = arith.constant dense<0.000000e+00> : vector<48x128xf32>
    %7 = tpu.matmul %0, %6, %cst_9 {dimension_numbers = #tpu.dot_dimension_numbers<[1], [0], [0], [1], [0, 0, 1, 1], [], []>} : vector<48x240xbf16>, vector<240x128xbf16>, vector<48x128xf32> -> vector<48x128xf32>
    %c0_10 = arith.constant 0 : index
    %c0_11 = arith.constant 0 : index
    %8 = vector.load %arg3[%c0_10, %c0_11] : memref<2x128xf32, #tpu.memory_space<vmem>>, vector<1x128xf32>
    %9 = vector.broadcast %8 : vector<1x128xf32> to vector<48x128xf32>
    %10 = arith.addf %7, %9 : vector<48x128xf32>
    %cst_12 = arith.constant 0.000000e+00 : f32
    %11 = vector.broadcast %cst_12 : f32 to vector<48x128xf32>
    %12 = arith.maximumf %10, %11 : vector<48x128xf32>
    %13 = vector.extract_strided_slice %12 {offsets = [0, 0], sizes = [48, 32], strides = [1, 1]} : vector<48x128xf32> to vector<48x32xf32>
    %14 = arith.truncf %13 : vector<48x32xf32> to vector<48x32xbf16>
    %c240 = arith.constant 240 : index
    %c0_13 = arith.constant 0 : index
    %15 = vector.load %arg2[%c240, %c0_13] : memref<400x128xbf16, #tpu.memory_space<vmem>>, vector<32x128xbf16>
    %cst_14 = arith.constant dense<0.000000e+00> : vector<48x128xf32>
    %16 = tpu.matmul %14, %15, %cst_14 {dimension_numbers = #tpu.dot_dimension_numbers<[1], [0], [0], [1], [0, 0, 1, 1], [], []>} : vector<48x32xbf16>, vector<32x128xbf16>, vector<48x128xf32> -> vector<48x128xf32>
    %17 = arith.truncf %16 : vector<48x128xf32> to vector<48x128xbf16>
    %c0_15 = arith.constant 0 : index
    %c0_16 = arith.constant 0 : index
    %18 = vector.load %arg5[%c0_15, %c0_16] : memref<240x128xbf16, #tpu.memory_space<vmem>>, vector<48x128xbf16>
    tpu.vector_store %arg5[%c0_15, %c0_16], %17 {strides = array<i32>} : memref<240x128xbf16, #tpu.memory_space<vmem>>, vector<48x128xbf16>,
    %c272 = arith.constant 272 : index
    %c0_17 = arith.constant 0 : index
    %19 = vector.load %arg2[%c272, %c0_17] : memref<400x128xbf16, #tpu.memory_space<vmem>>, vector<32x128xbf16>
    %cst_18 = arith.constant dense<0.000000e+00> : vector<48x128xf32>
    %20 = tpu.matmul %14, %19, %cst_18 {dimension_numbers = #tpu.dot_dimension_numbers<[1], [0], [0], [1], [0, 0, 1, 1], [], []>} : vector<48x32xbf16>, vector<32x128xbf16>, vector<48x128xf32> -> vector<48x128xf32>
    %21 = arith.truncf %20 : vector<48x128xf32> to vector<48x128xbf16>
    %c48 = arith.constant 48 : index
    %c0_19 = arith.constant 0 : index
    %22 = vector.load %arg5[%c48, %c0_19] : memref<240x128xbf16, #tpu.memory_space<vmem>>, vector<48x128xbf16>
    tpu.vector_store %arg5[%c48, %c0_19], %21 {strides = array<i32>} : memref<240x128xbf16, #tpu.memory_space<vmem>>, vector<48x128xbf16>,
    %c304 = arith.constant 304 : index
    %c0_20 = arith.constant 0 : index
    %23 = vector.load %arg2[%c304, %c0_20] : memref<400x128xbf16, #tpu.memory_space<vmem>>, vector<32x128xbf16>
    %cst_21 = arith.constant dense<0.000000e+00> : vector<48x128xf32>
    %24 = tpu.matmul %14, %23, %cst_21 {dimension_numbers = #tpu.dot_dimension_numbers<[1], [0], [0], [1], [0, 0, 1, 1], [], []>} : vector<48x32xbf16>, vector<32x128xbf16>, vector<48x128xf32> -> vector<48x128xf32>
    %25 = arith.truncf %24 : vector<48x128xf32> to vector<48x128xbf16>
    %c96 = arith.constant 96 : index
    %c0_22 = arith.constant 0 : index
    %26 = vector.load %arg5[%c96, %c0_22] : memref<240x128xbf16, #tpu.memory_space<vmem>>, vector<48x128xbf16>
    tpu.vector_store %arg5[%c96, %c0_22], %25 {strides = array<i32>} : memref<240x128xbf16, #tpu.memory_space<vmem>>, vector<48x128xbf16>,
    %c336 = arith.constant 336 : index
    %c0_23 = arith.constant 0 : index
    %27 = vector.load %arg2[%c336, %c0_23] : memref<400x128xbf16, #tpu.memory_space<vmem>>, vector<32x128xbf16>
    %cst_24 = arith.constant dense<0.000000e+00> : vector<48x128xf32>
    %28 = tpu.matmul %14, %27, %cst_24 {dimension_numbers = #tpu.dot_dimension_numbers<[1], [0], [0], [1], [0, 0, 1, 1], [], []>} : vector<48x32xbf16>, vector<32x128xbf16>, vector<48x128xf32> -> vector<48x128xf32>
    %29 = arith.truncf %28 : vector<48x128xf32> to vector<48x128xbf16>
    %c144 = arith.constant 144 : index
    %c0_25 = arith.constant 0 : index
    %30 = vector.load %arg5[%c144, %c0_25] : memref<240x128xbf16, #tpu.memory_space<vmem>>, vector<48x128xbf16>
    tpu.vector_store %arg5[%c144, %c0_25], %29 {strides = array<i32>} : memref<240x128xbf16, #tpu.memory_space<vmem>>, vector<48x128xbf16>,
    %c368 = arith.constant 368 : index
    %c0_26 = arith.constant 0 : index
    %31 = vector.load %arg2[%c368, %c0_26] : memref<400x128xbf16, #tpu.memory_space<vmem>>, vector<32x128xbf16>
    %cst_27 = arith.constant dense<0.000000e+00> : vector<48x128xf32>
    %32 = tpu.matmul %14, %31, %cst_27 {dimension_numbers = #tpu.dot_dimension_numbers<[1], [0], [0], [1], [0, 0, 1, 1], [], []>} : vector<48x32xbf16>, vector<32x128xbf16>, vector<48x128xf32> -> vector<48x128xf32>
    %33 = arith.truncf %32 : vector<48x128xf32> to vector<48x128xbf16>
    %c192 = arith.constant 192 : index
    %c0_28 = arith.constant 0 : index
    %34 = vector.load %arg5[%c192, %c0_28] : memref<240x128xbf16, #tpu.memory_space<vmem>>, vector<48x128xbf16>
    tpu.vector_store %arg5[%c192, %c0_28], %33 {strides = array<i32>} : memref<240x128xbf16, #tpu.memory_space<vmem>>, vector<48x128xbf16>,
    %c0_29 = arith.constant 0 : index
    %c0_30 = arith.constant 0 : index
    %35 = vector.load %arg5[%c0_29, %c0_30] : memref<240x128xbf16, #tpu.memory_space<vmem>>, vector<240x128xbf16>
    %cst_31 = arith.constant dense<0.000000e+00> : vector<48x128xf32>
    %36 = tpu.matmul %0, %35, %cst_31 {dimension_numbers = #tpu.dot_dimension_numbers<[1], [0], [0], [1], [0, 0, 1, 1], [], []>} : vector<48x240xbf16>, vector<240x128xbf16>, vector<48x128xf32> -> vector<48x128xf32>
    %c1 = arith.constant 1 : index
    %c0_32 = arith.constant 0 : index
    %37 = vector.load %arg3[%c1, %c0_32] : memref<2x128xf32, #tpu.memory_space<vmem>>, vector<1x128xf32>
    %38 = vector.broadcast %37 : vector<1x128xf32> to vector<48x128xf32>
    %39 = arith.addf %36, %38 : vector<48x128xf32>
    %c0_33 = arith.constant 0 : index
    %c0_34 = arith.constant 0 : index
    %40 = vector.load %arg4[%c0_33, %c0_34] : memref<48x128xf32, #tpu.memory_space<vmem>>, vector<48x128xf32>
    tpu.vector_store %arg4[%c0_33, %c0_34], %39 {strides = array<i32>} : memref<48x128xf32, #tpu.memory_space<vmem>>, vector<48x128xf32>,
    return
  }
}

</mosaic_0001>

<bundles_post_ra>
// kernel: rgcn_apply.1
= control target key start
LH: loop header
LB: loop body
LE: loop exit
PB: predicated region body
PF: predicated region fallthrough
CT: control target
= control target key end

     0   :  { %9 = vsyncpa [#allocation4], 0  ;;  %s1877_s0 = inlined_call_operand.hbm [shape: bf16[48,240], index: 0, kind: input, shape index: {}]   ;;  %s1878_s1 = inlined_call_operand.hbm [shape: bf16[240,240], index: 1, kind: input, shape index: {}]   ;;  %s1879_s2 = inlined_call_operand.hbm [shape: bf16[400,128], index: 2, kind: input, shape index: {}]   ;;  %s1880_s3 = inlined_call_operand.vmem [shape: f32[2,128], index: 3, kind: input, shape index: {}]   ;;  %s1881_s4 = inlined_call_operand.vmem [shape: f32[48,128], index: 4, kind: output, shape index: {}]  }
   0x1   :  { %10 = vsyncpa [#allocation6], 0  ;;  %s1588_s15 = smov [#allocation5]   ;;  %s1589_s17 = smov [#allocation3]  }
   0x2   :  { %s28_s16 = sshll.u32 %s1588_s15, 4  ;;  %s16_s18 = sshll.u32 %s1589_s17, 4  ;;  %s29_s16 = int_to_ptr.vmem [resolvable:$true] %s28_s16  ;;  %s1623_s18 = int_to_ptr.vmem [resolvable:$true] %s16_s18 }
   0x3   :  { %s1518_s21 = scalar_lea.hbm %s1878_s1, 3840 }
   0x4   :  { %p1519_p0 = scmp.ne.s32.totalorder %s1878_s1, %s1518_s21  ;;  %p1522_p1 = scmp.lt.u32.totalorder %s1518_s21, %s1878_s1 }
   0x6   :  { %p1524_p2 = pnand %p1522_p1, %p1519_p0 }
   0x8   :  { %1527 = shalt.err (!%p1524_p2)
}
   0x9   :  { %s1528_s26 = scalar_lea.vmem %s29_s16, 3840  ;;  %p1533_p4 = scmp.lt.s32.totalorder %s29_s16, %s29_s16 }
   0xa   :  { %p1529_p3 = scmp.ne.s32.totalorder %s29_s16, %s1528_s26  ;;  %p1534_p5 = scmp.lt.s32.totalorder %s1528_s26, %s1528_s26 }
   0xc   :  { %p1535_p6 = por %p1534_p5, %p1533_p4 }
   0xe   :  { %p1536_p7 = pnand %p1535_p6, %p1529_p3 }
  0x10   :  { %1539 = shalt.err (!%p1536_p7)
}
  0x11   :  { %s1590_s27 = smov 128   ;;  %s1591_s28 = smov 8  }
  0x12   :  { %34 = dma.hbm_to_vmem [thread:$0]  %s1878_s1, 3840, %s29_s16, [#allocation6], %s1590_s27, %s1590_s27, %s1591_s28  }
  0x13   :  { %s1540_s7 = scalar_lea.hbm %s1877_s0, 768 }
  0x14   :  { %p1541_p8 = scmp.ne.s32.totalorder %s1877_s0, %s1540_s7  ;;  %p1544_p9 = scmp.lt.u32.totalorder %s1540_s7, %s1877_s0 }
  0x16   :  { %p1546_p10 = pnand %p1544_p9, %p1541_p8 }
  0x18   :  { %1549 = shalt.err (!%p1546_p10)
}
  0x19   :  { %s1550_s12 = scalar_lea.vmem %s1623_s18, 768  ;;  %p1555_p12 = scmp.lt.s32.totalorder %s1623_s18, %s1623_s18 }
  0x1a   :  { %p1551_p11 = scmp.ne.s32.totalorder %s1623_s18, %s1550_s12  ;;  %p1556_p13 = scmp.lt.s32.totalorder %s1550_s12, %s1550_s12 }
  0x1c   :  { %p1557_p0 = por %p1556_p13, %p1555_p12 }
  0x1e   :  { %p1558_p1 = pnand %p1557_p0, %p1551_p11 }
  0x20   :  { %1561 = shalt.err (!%p1558_p1)
}
  0x21   :  { %22 = dma.hbm_to_vmem [thread:$0]  %s1877_s0, 768, %s1623_s18, [#allocation4], %s1590_s27, %s1590_s27, %s1591_s28  }
  0x22   :  { %s1592_s14 = smov [#allocation7]   ;;  %s1562_s19 = scalar_lea.hbm %s1879_s2, 3200 }
  0x23   :  { %s40_s15 = sshll.u32 %s1592_s14, 4  ;;  %p1563_p2 = scmp.ne.s32.totalorder %s1879_s2, %s1562_s19  ;;  %s41_s15 = int_to_ptr.vmem [resolvable:$true] %s40_s15 }
  0x24   :  { %p1566_p3 = scmp.lt.u32.totalorder %s1562_s19, %s1879_s2 }
  0x26   :  { %p1568_p4 = pnand %p1566_p3, %p1563_p2 }
  0x28   :  { %1571 = shalt.err (!%p1568_p4)
}
  0x29   :  { %s1572_s24 = scalar_lea.vmem %s41_s15, 3200  ;;  %p1577_p6 = scmp.lt.s32.totalorder %s41_s15, %s41_s15 }
  0x2a   :  { %p1573_p5 = scmp.ne.s32.totalorder %s41_s15, %s1572_s24  ;;  %p1578_p7 = scmp.lt.s32.totalorder %s1572_s24, %s1572_s24 }
  0x2c   :  { %p1579_p8 = por %p1578_p7, %p1577_p6 }
  0x2e   :  { %p1580_p9 = pnand %p1579_p8, %p1573_p5 }
  0x30   :  { %1583 = shalt.err (!%p1580_p9)
}
  0x31   :  { %s1593_s0 = smov 64   ;;  %s1594_s18 = smov 4  }
  0x32   :  { %46 = dma.hbm_to_vmem [thread:$0]  %s1879_s2, 3200, %s41_s15, [#allocation6], %s1593_s0, %s1593_s0, %s1594_s18  }
  0x33   :  { %1584 = dma.done.wait [#allocation4], 768  }
  0x34   :  { %1585 = vsyncadd [#allocation4], 4294966528 }
  0x35   :  { %1586 = dma.done.wait [#allocation6], 7040  }
  0x36   :  { %1587 = vsyncadd [#allocation6], 4294960256  ;;  %v1595_v0 = vmov 0   ;;  %v1439_v1 = vld [vmem:[#allocation7] sm:$0xff]   ;;  %v1440_v2 = vld [vmem:[#allocation7 + $0x8] sm:$0xff]   ;;  %vm350_vm0 = vcmask 916480  }
  0x37   :  { %396 = vmatprep.subr.bf16.mxu0 %v1595_v0  ;;  %1399 = vmatprep.subr.bf16.mxu1 %v1595_v0  ;;  %v1441_v3 = vld [vmem:[#allocation7 + $0x10] sm:$0xff]   ;;  %v1442_v4 = vld [vmem:[#allocation7 + $0x18] sm:$0xff]   ;;  %v1443_v5 = vld [vmem:[#allocation7 + $0x20] sm:$0xff]   ;;  %vm1597_vm1 = vmmov 0   ;;  %vm717_vm2 = vcmask 261120  }
  0x38   :  { %397 = vmatpush1.bf16.msra.mxu0 %v1439_v1  ;;  %v1456_v6 = vld [vmem:[#allocation5 + $0x4] ss:$8 sps:$4 sm:$0xff]   ;;  %v1444_v7 = vld [vmem:[#allocation7 + $0x28] sm:$0xff]   ;;  %v1447_v10 = vld [vmem:[#allocation7 + $0x40] sm:$0xff]  }
  0x39   :  { %398 = vmatprep.subr.bf16.mxu0 %v1595_v0  ;;  %1240 = vmatprep.mubr.msk.bf16.mxu0 %vm350_vm0, %v1456_v6  ;;  %v1445_v8 = vld [vmem:[#allocation7 + $0x30] sm:$0xff]   ;;  %v1446_v9 = vld [vmem:[#allocation7 + $0x38] sm:$0xff]   ;;  %v1448_v11 = vld [vmem:[#allocation7 + $0x48] sm:$0xff]  }
  0x3a   :  { %v1449_v12 = vld [vmem:[#allocation7 + $0x50] sm:$0xff]   ;;  %v1450_v13 = vld [vmem:[#allocation7 + $0x58] sm:$0xff]   ;;  %v1451_v14 = vld [vmem:[#allocation7 + $0x60] sm:$0xff]  }
  0x3b   :  { %v1452_v15 = vld [vmem:[#allocation7 + $0x68] sm:$0xff]   ;;  %v1453_v16 = vld [vmem:[#allocation7 + $0x70] sm:$0xff]  }
  0x3c   :  { %399 = vmatpush1.bf16.msra.mxu0 %v1440_v2  ;;  %v1454_v17 = vld [vmem:[#allocation5] ss:$8 sps:$4 sm:$0xff]   ;;  %v1457_v18 = vld [vmem:[#allocation5 + $0x14] ss:$8 sps:$4 sm:$0xff]   ;;  %v1459_v19 = vld [vmem:[#allocation5 + $0x10] ss:$8 sps:$4 sm:$0xff]  }
  0x3d   :  { %400 = vmatprep.subr.bf16.mxu0 %v1595_v0  ;;  %v1460_v20 = vld [vmem:[#allocation5 + $0x24] ss:$8 sps:$4 sm:$0xff]   ;;  %v1462_v21 = vld [vmem:[#allocation5 + $0x20] ss:$8 sps:$4 sm:$0xff]   ;;  %v1463_v22 = vld [vmem:[#allocation5 + $0x34] ss:$8 sps:$4 sm:$0xff]  }
  0x3e   :  { %v1465_v23 = vld [vmem:[#allocation5 + $0x30] ss:$8 sps:$4 sm:$0xff]   ;;  %v1466_v24 = vld [vmem:[#allocation5 + $0x44] ss:$8 sps:$4 sm:$0xff]   ;;  %v1468_v25 = vld [vmem:[#allocation5 + $0x40] ss:$8 sps:$4 sm:$0xff]  }
  0x3f   :  { %v1469_v26 = vld [vmem:[#allocation5 + $0x54] ss:$8 sps:$4 sm:$0xff]   ;;  %v1471_v27 = vld [vmem:[#allocation5 + $0x50] ss:$8 sps:$4 sm:$0xff]   ;;  %v1472_v28 = vld [vmem:[#allocation5 + $0x64] ss:$8 sps:$4 sm:$0xff]  }
  0x40   :  { %401 = vmatpush1.bf16.msra.mxu0 %v1441_v3  ;;  %v1474_v29 = vld [vmem:[#allocation5 + $0x60] ss:$8 sps:$4 sm:$0xff]   ;;  %v1475_v30 = vld [vmem:[#allocation5 + $0x74] ss:$8 sps:$4 sm:$0xff]   ;;  %v1477_v31 = vld [vmem:[#allocation5 + $0x70] ss:$8 sps:$4 sm:$0xff]  }
  0x41   :  { %402 = vmatprep.subr.bf16.mxu0 %v1595_v0  ;;  %v1478_v32 = vld [vmem:[#allocation5 + $0x84] ss:$8 sps:$4 sm:$0xff]   ;;  %v1480_v33 = vld [vmem:[#allocation5 + $0x80] ss:$8 sps:$4 sm:$0xff]   ;;  %v1481_v34 = vld [vmem:[#allocation5 + $0x94] ss:$8 sps:$4 sm:$0xff]  }
  0x42   :  { %v1483_v35 = vld [vmem:[#allocation5 + $0x90] ss:$8 sps:$4 sm:$0xff]   ;;  %v1484_v36 = vld [vmem:[#allocation5 + $0xa4] ss:$8 sps:$4 sm:$0xff]   ;;  %v1486_v37 = vld [vmem:[#allocation5 + $0xa0] ss:$8 sps:$4 sm:$0xff]  }
  0x43   :  { %v1487_v38 = vld [vmem:[#allocation5 + $0xb4] ss:$8 sps:$4 sm:$0xff]   ;;  %v1489_v39 = vld [vmem:[#allocation5 + $0xb0] ss:$8 sps:$4 sm:$0xff]   ;;  %v1490_v40 = vld [vmem:[#allocation5 + $0xc4] ss:$8 sps:$4 sm:$0xff]  }
  0x44   :  { %403 = vmatpush1.bf16.msra.mxu0 %v1442_v4  ;;  %v1492_v41 = vld [vmem:[#allocation5 + $0xc0] ss:$8 sps:$4 sm:$0xff]   ;;  %v1493_v42 = vld [vmem:[#allocation5 + $0xd4] ss:$8 sps:$4 sm:$0xff]   ;;  %v1495_v43 = vld [vmem:[#allocation5 + $0xd0] ss:$8 sps:$4 sm:$0xff]  }
  0x45   :  { %404 = vmatprep.subr.bf16.mxu0 %v1595_v0  ;;  %v1496_v44 = vld [vmem:[#allocation5 + $0xe4] ss:$8 sps:$4 sm:$0xff]   ;;  %v1498_v45 = vld [vmem:[#allocation5 + $0xe0] ss:$8 sps:$4 sm:$0xff]   ;;  %v1698_v46 = vld [vmem:[#allocation3 + $0x4] ss:$8 sps:$4 sm:$0xff]  }
  0x46   :  { %v1702_v48 = vld [vmem:[#allocation3 + $0x24] ss:$8 sps:$4 sm:$0xff]  }
  0x47   :  { %1264 = vmatprep.mubr.msk.bf16.mxu1 %vm350_vm0, %v1702_v48 }
  0x48   :  { %405 = vmatpush1.bf16.msra.mxu0 %v1443_v5 }
  0x49   :  { %406 = vmatprep.subr.bf16.mxu0 %v1595_v0 }
  0x4c   :  { %407 = vmatpush1.bf16.msra.mxu0 %v1444_v7 }
  0x4d   :  { %408 = vmatprep.subr.bf16.mxu0 %v1595_v0 }
  0x50   :  { %409 = vmatpush1.bf16.msra.mxu0 %v1445_v8 }
  0x51   :  { %410 = vmatprep.subr.bf16.mxu0 %v1595_v0 }
  0x54   :  { %411 = vmatpush1.bf16.msra.mxu0 %v1446_v9 }
  0x55   :  { %412 = vmatprep.subr.bf16.mxu0 %v1595_v0 }
  0x58   :  { %413 = vmatpush1.bf16.msra.mxu0 %v1447_v10 }
  0x59   :  { %414 = vmatprep.subr.bf16.mxu0 %v1595_v0 }
  0x5c   :  { %415 = vmatpush1.bf16.msra.mxu0 %v1448_v11 }
  0x5d   :  { %416 = vmatprep.subr.bf16.mxu0 %v1595_v0 }
  0x60   :  { %417 = vmatpush1.bf16.msra.mxu0 %v1449_v12 }
  0x61   :  { %418 = vmatprep.subr.bf16.mxu0 %v1595_v0 }
  0x64   :  { %419 = vmatpush1.bf16.msra.mxu0 %v1450_v13 }
  0x65   :  { %420 = vmatprep.subr.bf16.mxu0 %v1595_v0 }
  0x68   :  { %421 = vmatpush1.bf16.msra.mxu0 %v1451_v14 }
  0x69   :  { %422 = vmatprep.subr.bf16.mxu0 %v1595_v0 }
  0x6c   :  { %423 = vmatpush1.bf16.msra.mxu0 %v1452_v15 }
  0x6d   :  { %424 = vmatprep.subr.bf16.mxu0 %v1595_v0 }
  0x70   :  { %425 = vmatpush1.bf16.msra.mxu0 %v1453_v16 }
  0x71   :  { %635 = vmatprep.subr.bf16.mxu0 %v1595_v0 }
  0x73   :  { %429 = vmatmul.mubr.bf16.vlgmr.msra.gmra.mrb[0].mxu0 %v1454_v17 }
  0x74   :  { %1241 = vmatprep.mubr.msk.bf16.mxu0 %vm350_vm0, %v1457_v18 }
  0x7b   :  { %437 = vmatmul.mubr.bf16.gmra.mrb[4].mxu0 %v1459_v19 }
  0x7c   :  { %1242 = vmatprep.mubr.msk.bf16.mxu0 %vm350_vm0, %v1460_v20 }
  0x83   :  { %445 = vmatmul.mubr.bf16.gmra.mrb[8].mxu0 %v1462_v21 }
  0x84   :  { %1243 = vmatprep.mubr.msk.bf16.mxu0 %vm350_vm0, %v1463_v22 }
  0x8b   :  { %453 = vmatmul.mubr.bf16.gmra.mrb[12].mxu0 %v1465_v23 }
  0x8c   :  { %1244 = vmatprep.mubr.msk.bf16.mxu0 %vm350_vm0, %v1466_v24 }
  0x93   :  { %461 = vmatmul.mubr.bf16.gmra.mrb[16].mxu0 %v1468_v25 }
  0x94   :  { %1245 = vmatprep.mubr.msk.bf16.mxu0 %vm350_vm0, %v1469_v26 }
  0x9b   :  { %469 = vmatmul.mubr.bf16.gmra.mrb[20].mxu0 %v1471_v27 }
  0x9c   :  { %1246 = vmatprep.mubr.msk.bf16.mxu0 %vm350_vm0, %v1472_v28 }
  0xa3   :  { %477 = vmatmul.mubr.bf16.gmra.mrb[24].mxu0 %v1474_v29 }
  0xa4   :  { %1247 = vmatprep.mubr.msk.bf16.mxu0 %vm350_vm0, %v1475_v30 }
  0xab   :  { %485 = vmatmul.mubr.bf16.gmra.mrb[28].mxu0 %v1477_v31 }
  0xac   :  { %1248 = vmatprep.mubr.msk.bf16.mxu0 %vm350_vm0, %v1478_v32 }
  0xb3   :  { %493 = vmatmul.mubr.bf16.gmra.mrb[32].mxu0 %v1480_v33 }
  0xb4   :  { %1249 = vmatprep.mubr.msk.bf16.mxu0 %vm350_vm0, %v1481_v34 }
  0xbb   :  { %501 = vmatmul.mubr.bf16.gmra.mrb[36].mxu0 %v1483_v35 }
  0xbc   :  { %1250 = vmatprep.mubr.msk.bf16.mxu0 %vm350_vm0, %v1484_v36 }
  0xc3   :  { %509 = vmatmul.mubr.bf16.gmra.mrb[40].mxu0 %v1486_v37 }
  0xc4   :  { %1251 = vmatprep.mubr.msk.bf16.mxu0 %vm350_vm0, %v1487_v38 }
  0xcb   :  { %517 = vmatmul.mubr.bf16.gmra.mrb[44].mxu0 %v1489_v39 }
  0xcc   :  { %1252 = vmatprep.mubr.msk.bf16.mxu0 %vm350_vm0, %v1490_v40 }
  0xd3   :  { %525 = vmatmul.mubr.bf16.gmra.mrb[48].mxu0 %v1492_v41 }
  0xd4   :  { %1253 = vmatprep.mubr.msk.bf16.mxu0 %vm350_vm0, %v1493_v42 }
  0xdb   :  { %533 = vmatmul.mubr.bf16.gmra.mrb[52].mxu0 %v1495_v43 }
  0xdc   :  { %1254 = vmatprep.mubr.msk.bf16.mxu0 %vm350_vm0, %v1496_v44 }
  0xe3   :  { %541 = vmatmul.mubr.bf16.gmra.mrb[56].mxu0 %v1498_v45 }
  0xe4   :  { %1262 = vmatprep.mubr.msk.bf16.mxu0 %vm350_vm0, %v1698_v46 }
 0x146   :  { %v430_v47 = vpop.f32.mrb[0].mxu0 }
 0x147   :  { %v432_v49 = vpop.f32.mrb[1].mxu0 }
 0x148   :  { %v433_v50 = vpop.f32.mrb[2].mxu0 }
 0x149   :  { %v549_v51 = vpack.c.bf16 %v433_v50, %v430_v47  ;;  %v435_v52 = vpop.f32.mrb[3].mxu0 }
 0x14b   :  { %636 = vmatpush1.bf16.msra.mxu0 %v549_v51  ;;  %1414 = vmatpush1.bf16.msra.mxu1 %v549_v51 }
 0x14c   :  { %637 = vmatprep.subr.bf16.mxu0 %v1595_v0  ;;  %1400 = vmatprep.subr.bf16.mxu1 %v1595_v0 }
 0x14e   :  { %v438_v53 = vpop.f32.mrb[4].mxu0 }
 0x14f   :  { %v440_v54 = vpop.f32.mrb[5].mxu0 }
 0x150   :  { %v441_v55 = vpop.f32.mrb[6].mxu0 }
 0x151   :  { %v550_v56 = vpack.c.bf16 %v441_v55, %v438_v53  ;;  %v443_v57 = vpop.f32.mrb[7].mxu0 }
 0x153   :  { %638 = vmatpush1.bf16.msra.mxu0 %v550_v56  ;;  %1415 = vmatpush1.bf16.msra.mxu1 %v550_v56 }
 0x154   :  { %639 = vmatprep.subr.bf16.mxu0 %v1595_v0  ;;  %1401 = vmatprep.subr.bf16.mxu1 %v1595_v0 }
 0x156   :  { %v446_v58 = vpop.f32.mrb[8].mxu0 }
 0x157   :  { %v448_v59 = vpop.f32.mrb[9].mxu0 }
 0x158   :  { %v449_v60 = vpop.f32.mrb[10].mxu0 }
 0x159   :  { %v551_v61 = vpack.c.bf16 %v449_v60, %v446_v58  ;;  %v451_v62 = vpop.f32.mrb[11].mxu0 }
 0x15a   :  { %v1734_v62 = vld [vmem:[#allocation3] ss:$8 sps:$4 sm:$0xff]  }
 0x15b   :  { %640 = vmatpush1.bf16.msra.mxu0 %v551_v61  ;;  %1416 = vmatpush1.bf16.msra.mxu1 %v551_v61 }
 0x15c   :  { %641 = vmatprep.subr.bf16.mxu0 %v1595_v0  ;;  %1402 = vmatprep.subr.bf16.mxu1 %v1595_v0 }
 0x15e   :  { %v454_v63 = vpop.f32.mrb[12].mxu0 }
 0x15f   :  { %v456_v1 = vpop.f32.mrb[13].mxu0 }
 0x160   :  { %v457_v2 = vpop.f32.mrb[14].mxu0  ;;  %v1738_v1 = vld [vmem:[#allocation3 + $0x14] ss:$8 sps:$4 sm:$0xff]  }
 0x161   :  { %v552_v3 = vpack.c.bf16 %v457_v2, %v454_v63  ;;  %v459_v4 = vpop.f32.mrb[15].mxu0  ;;  %v1736_v63 = vld [vmem:[#allocation3 + $0x20] ss:$8 sps:$4 sm:$0xff]   ;;  %v1744_v2 = vld [vmem:[#allocation3 + $0x10] ss:$8 sps:$4 sm:$0xff]  }
 0x162   :  { %v1509_v4 = vld [vmem:[#allocation7 + $0xb8] sm:$0xff]  }
 0x163   :  { %642 = vmatpush1.bf16.msra.mxu0 %v552_v3  ;;  %1417 = vmatpush1.bf16.msra.mxu1 %v552_v3  ;;  %v1508_v3 = vld [vmem:[#allocation7 + $0x78] sm:$0xff]  }
 0x164   :  { %643 = vmatprep.subr.bf16.mxu0 %v1595_v0  ;;  %1403 = vmatprep.subr.bf16.mxu1 %v1595_v0 }
 0x166   :  { %v462_v5 = vpop.f32.mrb[16].mxu0 }
 0x167   :  { %v464_v6 = vpop.f32.mrb[17].mxu0 }
 0x168   :  { %v465_v7 = vpop.f32.mrb[18].mxu0  ;;  %v1510_v6 = vld [vmem:[#allocation7 + $0x80] sm:$0xff]  }
 0x169   :  { %v553_v8 = vpack.c.bf16 %v465_v7, %v462_v5  ;;  %v467_v9 = vpop.f32.mrb[19].mxu0  ;;  %v1596_v5 = vmov 0.0   ;;  %v1511_v7 = vld [vmem:[#allocation7 + $0xc0] sm:$0xff]  }
 0x16b   :  { %644 = vmatpush1.bf16.msra.mxu0 %v553_v8  ;;  %1418 = vmatpush1.bf16.msra.mxu1 %v553_v8  ;;  %v1255_v8 = vld [vmem:[%s1880_s3] ss:$0 sm:$0xff] }
 0x16c   :  { %645 = vmatprep.subr.bf16.mxu0 %v1595_v0  ;;  %1404 = vmatprep.subr.bf16.mxu1 %v1595_v0 }
 0x16e   :  { %v470_v10 = vpop.f32.mrb[20].mxu0 }
 0x16f   :  { %v472_v11 = vpop.f32.mrb[21].mxu0 }
 0x170   :  { %v473_v12 = vpop.f32.mrb[22].mxu0 }
 0x171   :  { %v554_v13 = vpack.c.bf16 %v473_v12, %v470_v10  ;;  %v475_v14 = vpop.f32.mrb[23].mxu0 }
 0x173   :  { %646 = vmatpush1.bf16.msra.mxu0 %v554_v13  ;;  %1419 = vmatpush1.bf16.msra.mxu1 %v554_v13 }
 0x174   :  { %647 = vmatprep.subr.bf16.mxu0 %v1595_v0  ;;  %1405 = vmatprep.subr.bf16.mxu1 %v1595_v0 }
 0x176   :  { %v478_v15 = vpop.f32.mrb[24].mxu0 }
 0x177   :  { %v480_v16 = vpop.f32.mrb[25].mxu0 }
 0x178   :  { %v481_v17 = vpop.f32.mrb[26].mxu0 }
 0x179   :  { %v555_v18 = vpack.c.bf16 %v481_v17, %v478_v15  ;;  %v483_v19 = vpop.f32.mrb[27].mxu0 }
 0x17b   :  { %648 = vmatpush1.bf16.msra.mxu0 %v555_v18  ;;  %1420 = vmatpush1.bf16.msra.mxu1 %v555_v18 }
 0x17c   :  { %649 = vmatprep.subr.bf16.mxu0 %v1595_v0  ;;  %1406 = vmatprep.subr.bf16.mxu1 %v1595_v0 }
 0x17e   :  { %v486_v20 = vpop.f32.mrb[28].mxu0 }
 0x17f   :  { %v488_v21 = vpop.f32.mrb[29].mxu0 }
 0x180   :  { %v489_v22 = vpop.f32.mrb[30].mxu0 }
 0x181   :  { %v556_v23 = vpack.c.bf16 %v489_v22, %v486_v20  ;;  %v491_v24 = vpop.f32.mrb[31].mxu0 }
 0x183   :  { %650 = vmatpush1.bf16.msra.mxu0 %v556_v23  ;;  %1421 = vmatpush1.bf16.msra.mxu1 %v556_v23 }
 0x184   :  { %651 = vmatprep.subr.bf16.mxu0 %v1595_v0  ;;  %1407 = vmatprep.subr.bf16.mxu1 %v1595_v0 }
 0x186   :  { %v494_v25 = vpop.f32.mrb[32].mxu0 }
 0x187   :  { %v496_v26 = vpop.f32.mrb[33].mxu0 }
 0x188   :  { %v497_v27 = vpop.f32.mrb[34].mxu0 }
 0x189   :  { %v557_v28 = vpack.c.bf16 %v497_v27, %v494_v25  ;;  %v499_v29 = vpop.f32.mrb[35].mxu0  ;;  %v1512_v25 = vld [vmem:[#allocation7 + $0x88] sm:$0xff]  }
 0x18b   :  { %652 = vmatpush1.bf16.msra.mxu0 %v557_v28  ;;  %1422 = vmatpush1.bf16.msra.mxu1 %v557_v28 }
 0x18c   :  { %653 = vmatprep.subr.bf16.mxu0 %v1595_v0  ;;  %1408 = vmatprep.subr.bf16.mxu1 %v1595_v0 }
 0x18e   :  { %v502_v30 = vpop.f32.mrb[36].mxu0 }
 0x18f   :  { %v504_v31 = vpop.f32.mrb[37].mxu0 }
 0x190   :  { %v505_v32 = vpop.f32.mrb[38].mxu0 }
 0x191   :  { %v558_v33 = vpack.c.bf16 %v505_v32, %v502_v30  ;;  %v507_v34 = vpop.f32.mrb[39].mxu0  ;;  %v1513_v32 = vld [vmem:[#allocation7 + $0x90] sm:$0xff]  }
 0x193   :  { %654 = vmatpush1.bf16.msra.mxu0 %v558_v33  ;;  %1423 = vmatpush1.bf16.msra.mxu1 %v558_v33 }
 0x194   :  { %655 = vmatprep.subr.bf16.mxu0 %v1595_v0  ;;  %1409 = vmatprep.subr.bf16.mxu1 %v1595_v0 }
 0x196   :  { %v510_v35 = vpop.f32.mrb[40].mxu0 }
 0x197   :  { %v512_v36 = vpop.f32.mrb[41].mxu0 }
 0x198   :  { %v513_v37 = vpop.f32.mrb[42].mxu0 }
 0x199   :  { %v559_v38 = vpack.c.bf16 %v513_v37, %v510_v35  ;;  %v515_v39 = vpop.f32.mrb[43].mxu0 }
 0x19a   :  { %v1515_v39 = vld [vmem:[#allocation7 + $0xa0] sm:$0xff]  }
 0x19b   :  { %656 = vmatpush1.bf16.msra.mxu0 %v559_v38  ;;  %1424 = vmatpush1.bf16.msra.mxu1 %v559_v38  ;;  %v1514_v38 = vld [vmem:[#allocation7 + $0x98] sm:$0xff]  }
 0x19c   :  { %657 = vmatprep.subr.bf16.mxu0 %v1595_v0  ;;  %1410 = vmatprep.subr.bf16.mxu1 %v1595_v0 }
 0x19e   :  { %v518_v40 = vpop.f32.mrb[44].mxu0 }
 0x19f   :  { %v520_v41 = vpop.f32.mrb[45].mxu0 }
 0x1a0   :  { %v521_v42 = vpop.f32.mrb[46].mxu0  ;;  %v1517_v41 = vld [vmem:[#allocation7 + $0xb0] sm:$0xff]  }
 0x1a1   :  { %v560_v43 = vpack.c.bf16 %v521_v42, %v518_v40  ;;  %v523_v44 = vpop.f32.mrb[47].mxu0  ;;  %v1516_v40 = vld [vmem:[#allocation7 + $0xa8] sm:$0xff]  }
 0x1a3   :  { %658 = vmatpush1.bf16.msra.mxu0 %v560_v43  ;;  %1425 = vmatpush1.bf16.msra.mxu1 %v560_v43 }
 0x1a4   :  { %659 = vmatprep.subr.bf16.mxu0 %v1595_v0  ;;  %1411 = vmatprep.subr.bf16.mxu1 %v1595_v0 }
 0x1a6   :  { %v526_v45 = vpop.f32.mrb[48].mxu0 }
 0x1a7   :  { %v528_v47 = vpop.f32.mrb[49].mxu0 }
 0x1a8   :  { %v529_v49 = vpop.f32.mrb[50].mxu0 }
 0x1a9   :  { %v561_v50 = vpack.c.bf16 %v529_v49, %v526_v45  ;;  %v531_v51 = vpop.f32.mrb[51].mxu0 }
 0x1ab   :  { %660 = vmatpush1.bf16.msra.mxu0 %v561_v50  ;;  %1426 = vmatpush1.bf16.msra.mxu1 %v561_v50 }
 0x1ac   :  { %661 = vmatprep.subr.bf16.mxu0 %v1595_v0  ;;  %1412 = vmatprep.subr.bf16.mxu1 %v1595_v0 }
 0x1ae   :  { %v534_v52 = vpop.f32.mrb[52].mxu0 }
 0x1af   :  { %v536_v53 = vpop.f32.mrb[53].mxu0 }
 0x1b0   :  { %v537_v54 = vpop.f32.mrb[54].mxu0 }
 0x1b1   :  { %v562_v55 = vpack.c.bf16 %v537_v54, %v534_v52  ;;  %v539_v56 = vpop.f32.mrb[55].mxu0 }
 0x1b3   :  { %662 = vmatpush1.bf16.msra.mxu0 %v562_v55  ;;  %1427 = vmatpush1.bf16.msra.mxu1 %v562_v55 }
 0x1b4   :  { %663 = vmatprep.subr.bf16.mxu0 %v1595_v0  ;;  %1413 = vmatprep.subr.bf16.mxu1 %v1595_v0 }
 0x1b6   :  { %v542_v57 = vpop.f32.mrb[56].mxu0 }
 0x1b7   :  { %v544_v58 = vpop.f32.mrb[57].mxu0 }
 0x1b8   :  { %v545_v59 = vpop.f32.mrb[58].mxu0 }
 0x1b9   :  { %v563_v60 = vpack.c.bf16 %v545_v59, %v542_v57  ;;  %v547_v61 = vpop.f32.mrb[59].mxu0 }
 0x1bb   :  { %664 = vmatpush1.bf16.msra.mxu0 %v563_v60  ;;  %1428 = vmatpush1.bf16.msra.mxu1 %v563_v60 }
 0x1bc   :  { %1319 = vmatprep.subr.bf16.mxu1 %v1596_v5  ;;  %1383 = vmatprep.subr.bf16.mxu0 %v1596_v5 }
 0x1be   :  { %668 = vmatmul.mubr.bf16.vlgmr.msra.gmra.mrb[60].mxu0 %v1734_v62  ;;  %684 = vmatmul.mubr.bf16.vlgmr.msra.gmra.mrb[0].mxu1 %v1736_v63 }
 0x1bf   :  { %1263 = vmatprep.mubr.msk.bf16.mxu0 %vm350_vm0, %v1738_v1  ;;  %1320 = vmatpush3.bf16.msra.mxu1 %v1508_v3 }
 0x1c0   :  { %1384 = vmatpush3.bf16.msra.mxu0 %v1509_v4  ;;  %1321 = vmatprep.subr.bf16.mxu1 %v1596_v5 }
 0x1c1   :  { %1385 = vmatprep.subr.bf16.mxu0 %v1596_v5  ;;  %1323 = vmatprep.mubr.msk.bf16.mxu1 %vm1597_vm1, %v1596_v5 }
 0x1c3   :  { %1322 = vmatpush3.bf16.msra.mxu1 %v1510_v6 }
 0x1c4   :  { %1386 = vmatpush3.bf16.msra.mxu0 %v1511_v7  ;;  %1335 = vmatprep.subr.bf16.mxu1 %v1596_v5 }
 0x1c6   :  { %676 = vmatmul.mubr.bf16.gmra.mrb[64].mxu0 %v1744_v2 }
 0x1c7   :  { %1387 = vmatprep.mubr.msk.bf16.mxu0 %vm1597_vm1, %v1596_v5 }
 0x291   :  { %v669_v9 = vpop.f32.mrb[60].mxu0  ;;  %v685_v10 = vpop.f32.mrb[0].mxu1 }
 0x292   :  { %v670_v11 = vadd.f32 %v1255_v8, %v669_v9  ;;  %v671_v12 = vpop.f32.mrb[61].mxu0  ;;  %v686_v13 = vadd.f32 %v1255_v8, %v685_v10  ;;  %v687_v14 = vpop.f32.mrb[1].mxu1 }
 0x293   :  { %v672_v15 = vpop.f32.mrb[62].mxu0  ;;  %v688_v16 = vpop.f32.mrb[2].mxu1 }
 0x294   :  { %v673_v17 = vadd.f32 %v1255_v8, %v672_v15  ;;  %v674_v18 = vpop.f32.mrb[63].mxu0  ;;  %v696_v19 = vmax.f32 %v686_v13, 0.0  ;;  %v689_v20 = vadd.f32 %v1255_v8, %v688_v16  ;;  %v690_v21 = vpop.f32.mrb[3].mxu1  ;;  %v692_v22 = vmax.f32 %v670_v11, 0.0 }
 0x296   :  { %v693_v23 = vmax.f32 %v673_v17, 0.0  ;;  %v697_v24 = vmax.f32 %v689_v20, 0.0 }
 0x298   :  { %v698_v26 = vpack.c.bf16 %v693_v23, %v692_v22  ;;  %v700_v27 = vpack.c.bf16 %v697_v24, %v696_v19 }
 0x299   :  { %v677_v28 = vpop.f32.mrb[64].mxu0 }
 0x29a   :  { %v678_v29 = vadd.f32 %v1255_v8, %v677_v28  ;;  %v679_v30 = vpop.f32.mrb[65].mxu0  ;;  %1324 = vmatmul.mubr.msk.bf16.vlgmr.msra.gmra.mrb[4].mxu1 %vm717_vm2, %v698_v26  ;;  %1388 = vmatmul.mubr.msk.bf16.vlgmr.msra.gmra.mrb[68].mxu0 %vm717_vm2, %v698_v26 }
 0x29b   :  { %v680_v31 = vpop.f32.mrb[66].mxu0  ;;  %1336 = vmatpush3.bf16.msra.mxu1 %v1512_v25  ;;  %1327 = vmatprep.mubr.msk.bf16.mxu1 %vm1597_vm1, %v1596_v5 }
 0x29c   :  { %v681_v33 = vadd.f32 %v1255_v8, %v680_v31  ;;  %v682_v34 = vpop.f32.mrb[67].mxu0  ;;  %1391 = vmatprep.mubr.msk.bf16.mxu0 %vm1597_vm1, %v1596_v5  ;;  %1337 = vmatprep.subr.bf16.mxu1 %v1596_v5  ;;  %v694_v35 = vmax.f32 %v678_v29, 0.0 }
 0x29e   :  { %v695_v36 = vmax.f32 %v681_v33, 0.0 }
 0x29f   :  { %1338 = vmatpush3.bf16.msra.mxu1 %v1513_v32 }
 0x2a0   :  { %v699_v37 = vpack.c.bf16 %v695_v36, %v694_v35  ;;  %1351 = vmatprep.subr.bf16.mxu1 %v1596_v5 }
 0x2a2   :  { %1328 = vmatmul.mubr.msk.bf16.gmra.mrb[8].mxu1 %vm717_vm2, %v699_v37  ;;  %1392 = vmatmul.mubr.msk.bf16.gmra.mrb[72].mxu0 %vm717_vm2, %v699_v37 }
 0x2a3   :  { %1331 = vmatprep.mubr.msk.bf16.mxu1 %vm1597_vm1, %v1596_v5  ;;  %1395 = vmatprep.mubr.msk.bf16.mxu0 %vm1597_vm1, %v1596_v5 }
 0x2aa   :  { %1332 = vmatmul.mubr.msk.bf16.gmra.mrb[12].mxu1 %vm717_vm2, %v700_v27  ;;  %1396 = vmatmul.mubr.msk.bf16.gmra.mrb[76].mxu0 %vm717_vm2, %v700_v27 }
 0x2ab   :  { %1339 = vmatprep.mubr.msk.bf16.mxu1 %vm1597_vm1, %v1596_v5 }
 0x2b2   :  { %1340 = vmatmul.mubr.msk.bf16.vlgmr.msra.gmra.mrb[16].mxu1 %vm717_vm2, %v698_v26 }
 0x2b3   :  { %1352 = vmatpush3.bf16.msra.mxu1 %v1514_v38  ;;  %1343 = vmatprep.mubr.msk.bf16.mxu1 %vm1597_vm1, %v1596_v5 }
 0x2b4   :  { %1353 = vmatprep.subr.bf16.mxu1 %v1596_v5 }
 0x2b7   :  { %1354 = vmatpush3.bf16.msra.mxu1 %v1515_v39 }
 0x2b8   :  { %1367 = vmatprep.subr.bf16.mxu1 %v1596_v5 }
 0x2ba   :  { %1344 = vmatmul.mubr.msk.bf16.gmra.mrb[20].mxu1 %vm717_vm2, %v699_v37 }
 0x2bb   :  { %1347 = vmatprep.mubr.msk.bf16.mxu1 %vm1597_vm1, %v1596_v5 }
 0x2c2   :  { %1348 = vmatmul.mubr.msk.bf16.gmra.mrb[24].mxu1 %vm717_vm2, %v700_v27 }
 0x2c3   :  { %1355 = vmatprep.mubr.msk.bf16.mxu1 %vm1597_vm1, %v1596_v5 }
 0x2ca   :  { %1356 = vmatmul.mubr.msk.bf16.vlgmr.msra.gmra.mrb[28].mxu1 %vm717_vm2, %v698_v26 }
 0x2cb   :  { %1368 = vmatpush3.bf16.msra.mxu1 %v1516_v40  ;;  %1359 = vmatprep.mubr.msk.bf16.mxu1 %vm1597_vm1, %v1596_v5 }
 0x2cc   :  { %1369 = vmatprep.subr.bf16.mxu1 %v1596_v5 }
 0x2cf   :  { %1370 = vmatpush3.bf16.msra.mxu1 %v1517_v41 }
 0x2d0   :  { %1126 = vmatprep.subr.bf16.mxu1 %v1595_v0 }
 0x2d2   :  { %1360 = vmatmul.mubr.msk.bf16.gmra.mrb[32].mxu1 %vm717_vm2, %v699_v37 }
 0x2d3   :  { %1363 = vmatprep.mubr.msk.bf16.mxu1 %vm1597_vm1, %v1596_v5 }
 0x2da   :  { %1364 = vmatmul.mubr.msk.bf16.gmra.mrb[36].mxu1 %vm717_vm2, %v700_v27 }
 0x2db   :  { %1371 = vmatprep.mubr.msk.bf16.mxu1 %vm1597_vm1, %v1596_v5 }
 0x2e2   :  { %1372 = vmatmul.mubr.msk.bf16.vlgmr.msra.gmra.mrb[40].mxu1 %vm717_vm2, %v698_v26 }
 0x2e3   :  { %1375 = vmatprep.mubr.msk.bf16.mxu1 %vm1597_vm1, %v1596_v5 }
 0x2ea   :  { %1376 = vmatmul.mubr.msk.bf16.gmra.mrb[44].mxu1 %vm717_vm2, %v699_v37 }
 0x2eb   :  { %1379 = vmatprep.mubr.msk.bf16.mxu1 %vm1597_vm1, %v1596_v5 }
 0x2f2   :  { %1380 = vmatmul.mubr.msk.bf16.gmra.mrb[48].mxu1 %vm717_vm2, %v700_v27 }
 0x2f3   :  { %1291 = vmatprep.mubr.msk.bf16.mxu1 %vm350_vm0, %v1698_v46 }
 0x36d   :  { %v761_v42 = vpop.f32.mrb[4].mxu1  ;;  %v1808_v43 = vpop.f32.mrb[68].mxu0 }
 0x36e   :  { %v1325_v44 = vpop.f32.mrb[5].mxu1  ;;  %v1389_v45 = vpop.f32.mrb[69].mxu0 }
 0x36f   :  { %v764_v47 = vpop.f32.mrb[6].mxu1  ;;  %v1810_v49 = vpop.f32.mrb[70].mxu0 }
 0x370   :  { %v784_v50 = vpack.c.bf16 %v764_v47, %v761_v42  ;;  %v1100_v51 = vpack.c.bf16 %v1810_v49, %v1808_v43  ;;  %v1326_v52 = vpop.f32.mrb[7].mxu1  ;;  %v1390_v53 = vpop.f32.mrb[71].mxu0 }
 0x372   :  { %1127 = vmatpush1.bf16.msra.mxu1 %v784_v50 }
 0x373   :  { %1128 = vmatprep.subr.bf16.mxu1 %v1595_v0 }
 0x375   :  { %v769_v54 = vpop.f32.mrb[8].mxu1  ;;  %v1815_v55 = vpop.f32.mrb[72].mxu0 }
 0x376   :  { %v1329_v46 = vpop.f32.mrb[9].mxu1  ;;  %v1393_v56 = vpop.f32.mrb[73].mxu0 }
 0x377   :  { %v772_v57 = vpop.f32.mrb[10].mxu1  ;;  %v1817_v58 = vpop.f32.mrb[74].mxu0 }
 0x378   :  { %v785_v59 = vpack.c.bf16 %v772_v57, %v769_v54  ;;  %v1101_v60 = vpack.c.bf16 %v1817_v58, %v1815_v55  ;;  %v1330_v61 = vpop.f32.mrb[11].mxu1  ;;  %v1394_v3 = vpop.f32.mrb[75].mxu0 }
 0x37a   :  { %1129 = vmatpush1.bf16.msra.mxu1 %v785_v59 }
 0x37b   :  { %1130 = vmatprep.subr.bf16.mxu1 %v1595_v0 }
 0x37d   :  { %v777_v4 = vpop.f32.mrb[12].mxu1  ;;  %v1822_v5 = vpop.f32.mrb[76].mxu0 }
 0x37e   :  { %v1333_v6 = vpop.f32.mrb[13].mxu1  ;;  %v1397_v7 = vpop.f32.mrb[77].mxu0 }
 0x37f   :  { %v780_v8 = vpop.f32.mrb[14].mxu1  ;;  %v1824_v9 = vpop.f32.mrb[78].mxu0 }
 0x380   :  { %v786_v10 = vpack.c.bf16 %v780_v8, %v777_v4  ;;  %v1102_v11 = vpack.c.bf16 %v1824_v9, %v1822_v5  ;;  %v1334_v12 = vpop.f32.mrb[15].mxu1  ;;  %v1398_v13 = vpop.f32.mrb[79].mxu0 }
 0x382   :  { %1131 = vmatpush1.bf16.msra.mxu1 %v786_v10 }
 0x383   :  { %1132 = vmatprep.subr.bf16.mxu1 %v1595_v0 }
 0x385   :  { %v840_v14 = vpop.f32.mrb[16].mxu1 }
 0x386   :  { %v1341_v15 = vpop.f32.mrb[17].mxu1 }
 0x387   :  { %v843_v16 = vpop.f32.mrb[18].mxu1 }
 0x388   :  { %v863_v17 = vpack.c.bf16 %v843_v16, %v840_v14  ;;  %v1342_v18 = vpop.f32.mrb[19].mxu1 }
 0x38a   :  { %1133 = vmatpush1.bf16.msra.mxu1 %v863_v17 }
 0x38b   :  { %1134 = vmatprep.subr.bf16.mxu1 %v1595_v0 }
 0x38d   :  { %v848_v19 = vpop.f32.mrb[20].mxu1 }
 0x38e   :  { %v1345_v20 = vpop.f32.mrb[21].mxu1 }
 0x38f   :  { %v851_v21 = vpop.f32.mrb[22].mxu1 }
 0x390   :  { %v864_v22 = vpack.c.bf16 %v851_v21, %v848_v19  ;;  %v1346_v23 = vpop.f32.mrb[23].mxu1 }
 0x392   :  { %1135 = vmatpush1.bf16.msra.mxu1 %v864_v22 }
 0x393   :  { %1136 = vmatprep.subr.bf16.mxu1 %v1595_v0 }
 0x395   :  { %v856_v24 = vpop.f32.mrb[24].mxu1 }
 0x396   :  { %v1349_v25 = vpop.f32.mrb[25].mxu1 }
 0x397   :  { %v859_v26 = vpop.f32.mrb[26].mxu1 }
 0x398   :  { %v865_v27 = vpack.c.bf16 %v859_v26, %v856_v24  ;;  %v1350_v28 = vpop.f32.mrb[27].mxu1 }
 0x39a   :  { %1137 = vmatpush1.bf16.msra.mxu1 %v865_v27 }
 0x39b   :  { %1138 = vmatprep.subr.bf16.mxu1 %v1595_v0 }
 0x39d   :  { %v919_v29 = vpop.f32.mrb[28].mxu1 }
 0x39e   :  { %v1357_v30 = vpop.f32.mrb[29].mxu1 }
 0x39f   :  { %v922_v31 = vpop.f32.mrb[30].mxu1 }
 0x3a0   :  { %v942_v32 = vpack.c.bf16 %v922_v31, %v919_v29  ;;  %v1358_v33 = vpop.f32.mrb[31].mxu1 }
 0x3a2   :  { %1139 = vmatpush1.bf16.msra.mxu1 %v942_v32 }
 0x3a3   :  { %1140 = vmatprep.subr.bf16.mxu1 %v1595_v0 }
 0x3a5   :  { %v927_v34 = vpop.f32.mrb[32].mxu1 }
 0x3a6   :  { %v1361_v35 = vpop.f32.mrb[33].mxu1 }
 0x3a7   :  { %v930_v36 = vpop.f32.mrb[34].mxu1 }
 0x3a8   :  { %v943_v37 = vpack.c.bf16 %v930_v36, %v927_v34  ;;  %v1362_v38 = vpop.f32.mrb[35].mxu1 }
 0x3aa   :  { %1141 = vmatpush1.bf16.msra.mxu1 %v943_v37 }
 0x3ab   :  { %1142 = vmatprep.subr.bf16.mxu1 %v1595_v0 }
 0x3ad   :  { %v935_v39 = vpop.f32.mrb[36].mxu1 }
 0x3ae   :  { %v1365_v40 = vpop.f32.mrb[37].mxu1 }
 0x3af   :  { %v938_v41 = vpop.f32.mrb[38].mxu1 }
 0x3b0   :  { %v944_v42 = vpack.c.bf16 %v938_v41, %v935_v39  ;;  %v1366_v44 = vpop.f32.mrb[39].mxu1 }
 0x3b2   :  { %1143 = vmatpush1.bf16.msra.mxu1 %v944_v42 }
 0x3b3   :  { %1144 = vmatprep.subr.bf16.mxu1 %v1595_v0 }
 0x3b5   :  { %v998_v45 = vpop.f32.mrb[40].mxu1 }
 0x3b6   :  { %v1373_v47 = vpop.f32.mrb[41].mxu1 }
 0x3b7   :  { %v1001_v50 = vpop.f32.mrb[42].mxu1 }
 0x3b8   :  { %v1021_v52 = vpack.c.bf16 %v1001_v50, %v998_v45  ;;  %v1374_v53 = vpop.f32.mrb[43].mxu1 }
 0x3ba   :  { %1145 = vmatpush1.bf16.msra.mxu1 %v1021_v52 }
 0x3bb   :  { %1146 = vmatprep.subr.bf16.mxu1 %v1595_v0 }
 0x3bd   :  { %v1006_v54 = vpop.f32.mrb[44].mxu1 }
 0x3be   :  { %v1377_v46 = vpop.f32.mrb[45].mxu1 }
 0x3bf   :  { %v1009_v56 = vpop.f32.mrb[46].mxu1 }
 0x3c0   :  { %v1022_v57 = vpack.c.bf16 %v1009_v56, %v1006_v54  ;;  %v1378_v59 = vpop.f32.mrb[47].mxu1 }
 0x3c2   :  { %1147 = vmatpush1.bf16.msra.mxu1 %v1022_v57 }
 0x3c3   :  { %1148 = vmatprep.subr.bf16.mxu1 %v1595_v0 }
 0x3c5   :  { %v1014_v61 = vpop.f32.mrb[48].mxu1 }
 0x3c6   :  { %v1381_v3 = vpop.f32.mrb[49].mxu1 }
 0x3c7   :  { %v1017_v4 = vpop.f32.mrb[50].mxu1 }
 0x3c8   :  { %v1023_v6 = vpack.c.bf16 %v1017_v4, %v1014_v61  ;;  %v1382_v7 = vpop.f32.mrb[51].mxu1 }
 0x3ca   :  { %1149 = vmatpush1.bf16.msra.mxu1 %v1023_v6 }
 0x3cb   :  { %1150 = vmatprep.subr.bf16.mxu1 %v1595_v0 }
 0x3ce   :  { %1151 = vmatpush1.bf16.msra.mxu1 %v1100_v51 }
 0x3cf   :  { %1152 = vmatprep.subr.bf16.mxu1 %v1595_v0 }
 0x3d2   :  { %1153 = vmatpush1.bf16.msra.mxu1 %v1101_v60 }
 0x3d3   :  { %1154 = vmatprep.subr.bf16.mxu1 %v1595_v0  ;;  %v1290_v0 = vld [vmem:[%s1880_s3 + $0x1] ss:$0 sm:$0xff] }
 0x3d6   :  { %1155 = vmatpush1.bf16.msra.mxu1 %v1102_v11 }
 0x3d9   :  { %1159 = vmatmul.mubr.bf16.vlgmr.msra.gmra.mrb[52].mxu1 %v1734_v62 }
 0x3da   :  { %1292 = vmatprep.mubr.msk.bf16.mxu1 %vm350_vm0, %v1738_v1 }
 0x3e1   :  { %1167 = vmatmul.mubr.bf16.gmra.mrb[56].mxu1 %v1744_v2 }
 0x3e2   :  { %1293 = vmatprep.mubr.msk.bf16.mxu1 %vm350_vm0, %v1702_v48 }
 0x3e9   :  { %1175 = vmatmul.mubr.bf16.gmra.mrb[60].mxu1 %v1736_v63 }
 0x4ac   :  { %v1160_v43 = vpop.f32.mrb[52].mxu1 }
 0x4ad   :  { %v1161_v49 = vadd.f32 %v1290_v0, %v1160_v43  ;;  %v1162_v51 = vpop.f32.mrb[53].mxu1 }
 0x4ae   :  { %v1163_v55 = vpop.f32.mrb[54].mxu1 }
 0x4af   :  { %1183 = vst [vmem:[%s1881_s4] sm:$0xff] %v1161_v49  ;;  %v1164_v62 = vadd.f32 %v1290_v0, %v1163_v55  ;;  %v1165_v1 = vpop.f32.mrb[55].mxu1 }
 0x4b1   :  { %1184 = vst [vmem:[%s1881_s4 + $0x8] sm:$0xff] %v1164_v62 }
 0x4b4   :  { %v1168_v48 = vpop.f32.mrb[56].mxu1 }
 0x4b5   :  { %v1169_v63 = vadd.f32 %v1290_v0, %v1168_v48  ;;  %v1170_v2 = vpop.f32.mrb[57].mxu1 }
 0x4b6   :  { %v1171_v58 = vpop.f32.mrb[58].mxu1 }
 0x4b7   :  { %1185 = vst [vmem:[%s1881_s4 + $0x10] sm:$0xff] %v1169_v63  ;;  %v1172_v60 = vadd.f32 %v1290_v0, %v1171_v58  ;;  %v1173_v5 = vpop.f32.mrb[59].mxu1 }
 0x4b9   :  { %1186 = vst [vmem:[%s1881_s4 + $0x18] sm:$0xff] %v1172_v60 }
 0x4bc   :  { %v1176_v8 = vpop.f32.mrb[60].mxu1 }
 0x4bd   :  { %v1177_v9 = vadd.f32 %v1290_v0, %v1176_v8  ;;  %v1178_v10 = vpop.f32.mrb[61].mxu1 }
 0x4be   :  { %v1179_v11 = vpop.f32.mrb[62].mxu1 }
 0x4bf   :  { %1187 = vst [vmem:[%s1881_s4 + $0x20] sm:$0xff] %v1177_v9  ;;  %v1180_v12 = vadd.f32 %v1290_v0, %v1179_v11  ;;  %v1181_v13 = vpop.f32.mrb[63].mxu1 }
 0x4c1   :  { %1188 = vst [vmem:[%s1881_s4 + $0x28] sm:$0xff] %v1180_v12 }
 0x4c2   :  { %1193 = vsyncpa [#allocation4], 1 }
 0x4c3   :  { %1194 = vsyncpa [#allocation6], 1 }

</bundles_post_ra>
